<compile_context>
chip_gen: v7x
topology: tpu7x:2x2x1
jax: 0.10.0
libtpu: 0.0.40
codegen_flags: <defaults>
</compile_context>

<pallas_src>
import math
from functools import partial

import jax
import jax.numpy as jnp
from jax import lax
from jax.experimental import pallas as pl
from jax.experimental.pallas import tpu as pltpu

H = 14
W = 14
HW = H * W  # 196 -- hard-coded in the reference module's reshapes


def _sh_attention_kernel(x_ref, wqk_ref, wv_ref, z_ref, *, cp):
    """One grid step processes bt = lanes // HW batch elements.

    x_ref   : (Cin, lanes)      bf16   lanes = bt*HW, batch-major over 196-lane segments
    wqk_ref : (4*cp, Cin)       bf16   rows = [Wq1; Wk1*scale; Wq2; Wk2*scale]
    wv_ref  : (2*cp, Cin)       bf16   rows = [Wv1; Wv2]
    z_ref   : (2*cp, lanes)     bf16   rows = [Z1; Z2]
    """
    lanes = x_ref.shape[1]
    bt = lanes // HW

    x = x_ref[...]  # (Cin, lanes) bf16

    # Two fused MXU passes: Q1/K1/Q2/K2 and V1/V2, f32 accumulation.
    # TODO(synk): for production-sized Cout (Cp >~ 64) split these matmuls along the
    # output-channel dim (staging through VMEM scratch) to bound the f32 intermediate.
    qk = jnp.dot(wqk_ref[...], x, preferred_element_type=jnp.float32)  # (4*cp, lanes)
    v = jnp.dot(wv_ref[...], x, preferred_element_type=jnp.float32)    # (2*cp, lanes)

    q1 = qk[0 * cp:1 * cp]
    k1 = qk[1 * cp:2 * cp]   # already scaled by 1/sqrt(Cout)
    q2 = qk[2 * cp:3 * cp]
    k2 = qk[3 * cp:4 * cp]   # already scaled by 1/sqrt(Cout)
    v1 = v[:cp]
    v2 = v[cp:]

    # Score rows: channel (sublane) sums; padded channels are zero.
    s11 = jnp.sum(q1 * k1, axis=0, keepdims=True)  # (1, lanes)
    s12 = jnp.sum(q1 * k2, axis=0, keepdims=True)
    s21 = jnp.sum(q2 * k1, axis=0, keepdims=True)
    s22 = jnp.sum(q2 * k2, axis=0, keepdims=True)

    # Each batch element owns a contiguous 196-lane segment; its softmax runs jointly
    # over its two score rows (392 entries).  Segmented max / sum are implemented as
    # masked full-width reductions (bt is small & static), which keeps every op
    # lane-dense and avoids in-kernel reshapes / unaligned dynamic lane slices.
    idx = lax.broadcasted_iota(jnp.int32, (1, lanes), 1)
    seg_masks = [(idx >= b * HW) & (idx < (b + 1) * HW) for b in range(bt)]
    neg_inf = jnp.float32(-jnp.inf)

    def joint_softmax(sa, sb):
        s_pair = jnp.concatenate([sa, sb], axis=0)          # (2, lanes)
        pair_max = jnp.max(s_pair, axis=0, keepdims=True)   # (1, lanes)
        m = jnp.full((1, lanes), neg_inf, jnp.float32)
        for mask in seg_masks:                               # static unroll (bt small)
            mb = jnp.max(jnp.where(mask, pair_max, neg_inf), keepdims=True)  # (1, 1)
            m = jnp.where(mask, mb, m)
        e = jnp.exp(s_pair - m)                              # (2, lanes), one EUP pass
        pair_sum = jnp.sum(e, axis=0, keepdims=True)         # (1, lanes)
        d = jnp.zeros((1, lanes), jnp.float32)
        for mask in seg_masks:
            db = jnp.sum(jnp.where(mask, pair_sum, 0.0), keepdims=True)      # (1, 1)
            d = jnp.where(mask, db, d)
        p = e * pl.reciprocal(d, approx=True)                # EUP, off the VPU path
        return p[0:1], p[1:2]                                # (1, lanes) each

    p11, p12 = joint_softmax(s11, s12)
    p21, p22 = joint_softmax(s21, s22)

    # Z1 = p11*V1 + p12*V2 ; Z2 = p21*V1 + p22*V2 ; one merged lane-dense bf16 store.
    z1 = p11 * v1 + p12 * v2                                 # (cp, lanes) f32
    z2 = p21 * v1 + p22 * v2
    z_ref[...] = jnp.concatenate([z1, z2], axis=0).astype(z_ref.dtype)


def _choose_batch_tiling(batch):
    """Pick (padded_batch, bt).

    Lane-density rule: every block's last dim must be a multiple of 128 unless the
    block spans the whole array, so bt must be a multiple of 32 (32*196 = 49*128) or
    equal the padded batch.  Small batches run as one full-array step (best for
    single-TC v5e/v6e); larger batches are padded to a multiple of 32 and tiled,
    keeping >=2 grid steps when possible so both v7x TensorCores get work.
    """
    if batch <= 32:
        return batch, batch
    padded = ((batch + 31) // 32) * 32
    for bt in (64, 32):
        if padded % bt == 0 and padded // bt >= 2:
            return padded, bt
    return padded, 32


def _vmem_estimate(cin, cp, lanes, out_bytes=2):
    """Per-step VMEM bound: double-buffered pipeline I/O + f32 intermediates + headroom."""
    io = 2 * (cin * lanes * 2                 # x block (bf16)
              + 2 * cp * lanes * out_bytes    # merged z block
              + 6 * cp * cin * 2)             # packed weights (bf16)
    intermediates = 8 * cp * lanes * 4 + 64 * lanes * 4
    return int(min(96 << 20, io + intermediates + (4 << 20)))


def sh_attention(x1, x2, params, *, out_dtype=jnp.bfloat16):
    """x1, x2: NCHW float arrays (B, Cin, 14, 14).  x2 is unused (as in the PyTorch module)."""
    del x2  # the reference forward() never reads x2
    B, Cin, Hh, Ww = x1.shape
    assert (Hh, Ww) == (H, W), "SHattention hard-codes a 14x14 spatial grid"
    Cout = params["wq1"].shape[0]
    Cp = ((Cout + 7) // 8) * 8
    scale = 1.0 / math.sqrt(Cout)

    # Pack the six (Cout, Cin) conv weights; fold the score scale into K1/K2.
    def prep(name, s=1.0):
        w = params[name].astype(jnp.float32) * s
        return jnp.pad(w, ((0, Cp - Cout), (0, 0)))

    w_qk = jnp.concatenate(
        [prep("wq1"), prep("wk1", scale), prep("wq2"), prep("wk2", scale)],
        axis=0).astype(jnp.bfloat16)                              # (4*Cp, Cin)
    w_v = jnp.concatenate([prep("wv1"), prep("wv2")], axis=0).astype(jnp.bfloat16)  # (2*Cp, Cin)

    Bp, bt = _choose_batch_tiling(B)
    lanes = bt * HW

    # (B, Cin, 14, 14) -> (Cin, Bp*HW): fold batch into the lane / matmul-N dimension.
    x = x1.reshape(B, Cin, HW)
    if Bp != B:
        x = jnp.pad(x, ((0, Bp - B), (0, 0), (0, 0)))
    x = jnp.transpose(x, (1, 0, 2)).reshape(Cin, Bp * HW).astype(jnp.bfloat16)

    kernel = partial(_sh_attention_kernel, cp=Cp)
    cost = pl.CostEstimate(
        flops=2 * 6 * Cp * Cin * Bp * HW + 12 * Cp * Bp * HW,
        transcendentals=4 * Bp * HW,
        bytes_accessed=x.size * 2 + (w_qk.size + w_v.size) * 2 + 2 * Cp * Bp * HW * 2,
    )

    z = pl.pallas_call(
        kernel,
        out_shape=jax.ShapeDtypeStruct((2 * Cp, Bp * HW), out_dtype),
        grid=(Bp // bt,),
        in_specs=[pl.BlockSpec((Cin, lanes), lambda i: (0, i)),
                  pl.BlockSpec((4 * Cp, Cin), lambda i: (0, 0)),
                  pl.BlockSpec((2 * Cp, Cin), lambda i: (0, 0))],
        out_specs=pl.BlockSpec((2 * Cp, lanes), lambda i: (0, i)),
        compiler_params=pltpu.CompilerParams(
            dimension_semantics=("parallel",),
            vmem_limit_bytes=_vmem_estimate(Cin, Cp, lanes)),
        cost_estimate=cost,
    )(x, w_qk, w_v)

    # (2*Cp, Bp*HW) -> (Bp, 2*Cp, HW) -> strip channel/batch padding -> two NCHW tensors.
    z = z.reshape(2 * Cp, Bp, HW).transpose(1, 0, 2)
    z1 = z[:B, :Cout].reshape(B, Cout, H, W)
    z2 = z[:B, Cp:Cp + Cout].reshape(B, Cout, H, W)
    return z1, z2


def _reference(x1, params):
    """Pure-JAX reference mirroring the PyTorch forward.

    Projection inputs (x, weights, with the score scale folded into K) are rounded to
    bf16 exactly as the kernel does; softmax / accumulation stay in f32, so the
    comparison isolates kernel correctness rather than bf16 quantization.
    """
    B, Cin, _, _ = x1.shape
    Cout = params["wq1"].shape[0]
    scale = 1.0 / math.sqrt(Cout)
    xb = x1.reshape(B, Cin, HW).astype(jnp.bfloat16).astype(jnp.float32)

    def proj(w, s=1.0):
        wb = (w.astype(jnp.float32) * s).astype(jnp.bfloat16).astype(jnp.float32)
        return jnp.einsum("oc,bcp->bop", wb, xb, precision=jax.lax.Precision.HIGHEST)

    Q1, K1, V1 = proj(params["wq1"]), proj(params["wk1"], scale), proj(params["wv1"])
    Q2, K2, V2 = proj(params["wq2"]), proj(params["wk2"], scale), proj(params["wv2"])

    def attend(Q):
        s1 = jnp.sum(Q * K1, axis=1)                       # (B, HW), scale already in K
        s2 = jnp.sum(Q * K2, axis=1)
        sm = jax.nn.softmax(jnp.concatenate([s1, s2], axis=1), axis=1)
        p1 = sm[:, :HW][:, None, :]
        p2 = sm[:, HW:][:, None, :]
        return p1 * V1 + p2 * V2                           # (B, Cout, HW)

    return (attend(Q1).reshape(B, Cout, H, W),
            attend(Q2).reshape(B, Cout, H, W))


def make_params(key, inplanes, outplanes):
    """Deterministic weights. Conv2d(k=1, bias=False) weight (Cout, Cin, 1, 1) stored as (Cout, Cin)."""
    keys = jax.random.split(key, 6)
    bound = 1.0 / math.sqrt(inplanes)  # kaiming-uniform-ish fan_in bound
    names = ["wq1", "wk1", "wv1", "wq2", "wk2", "wv2"]
    return {n: jax.random.uniform(k, (outplanes, inplanes), jnp.float32, -bound, bound)
            for n, k in zip(names, keys)}


if __name__ == "__main__":
    B, Cin, Cout = 2, 4, 8
    key = jax.random.PRNGKey(0)
    kx1, kx2, kp = jax.random.split(key, 3)

    x1 = jax.random.normal(kx1, (B, Cin, H, W), jnp.float32)
    x2 = jax.random.normal(kx2, (B, Cin, H, W), jnp.float32)  # unused, matches module semantics
    params = make_params(kp, Cin, Cout)

    z1, z2 = sh_attention(x1, x2, params)
    jax.block_until_ready((z1, z2))

    r1, r2 = _reference(x1, params)
    assert z1.shape == (B, Cout, H, W) and z2.shape == (B, Cout, H, W)
    z1f = z1.astype(jnp.float32)
    z2f = z2.astype(jnp.float32)
    # bf16 MXU inputs + bf16 output store + approx reciprocal => small tolerance.
    assert jnp.allclose(z1f, r1, atol=5e-4, rtol=1e-2), float(jnp.max(jnp.abs(z1f - r1)))
    assert jnp.allclose(z2f, r2, atol=5e-4, rtol=1e-2), float(jnp.max(jnp.abs(z2f - r2)))

    print("KERNEL_OK")
</pallas_src>

<mosaic_0001>
module attributes {stable_mosaic.version = 11 : i64} {
  func.func @_sh_attention_kernel(%arg0: i32, %arg1: memref<4x392xbf16, #tpu.memory_space<vmem>>, %arg2: memref<32x4xbf16, #tpu.memory_space<vmem>>, %arg3: memref<16x4xbf16, #tpu.memory_space<vmem>>, %arg4: memref<16x392xbf16, #tpu.memory_space<vmem>>) attributes {dimension_semantics = [#tpu.dimension_semantics<parallel>], iteration_bounds = array<i64: 1>, scalar_prefetch = 0 : i64, scratch_operands = 0 : i64, tpu.core_type = #tpu.core_type<tc>, window_params = [{transform_indices = @transform_0, window_bounds = array<i64: 4, 392>}, {pipeline_mode = #tpu.pipeline_mode<synchronous>, transform_indices = @transform_1, window_bounds = array<i64: 32, 4>}, {pipeline_mode = #tpu.pipeline_mode<synchronous>, transform_indices = @transform_2, window_bounds = array<i64: 16, 4>}, {transform_indices = @transform_3, window_bounds = array<i64: 16, 392>}]} {
    %c0 = arith.constant 0 : index
    %c0_0 = arith.constant 0 : index
    %0 = vector.load %arg1[%c0, %c0_0] : memref<4x392xbf16, #tpu.memory_space<vmem>>, vector<4x392xbf16>
    %c0_1 = arith.constant 0 : index
    %c0_2 = arith.constant 0 : index
    %1 = vector.load %arg2[%c0_1, %c0_2] : memref<32x4xbf16, #tpu.memory_space<vmem>>, vector<32x4xbf16>
    %cst = arith.constant dense<0.000000e+00> : vector<32x392xf32>
    %2 = tpu.matmul %1, %0, %cst {dimension_numbers = #tpu.dot_dimension_numbers<[1], [0], [0], [1], [0, 0, 1, 1], [], []>} : vector<32x4xbf16>, vector<4x392xbf16>, vector<32x392xf32> -> vector<32x392xf32>
    %c0_3 = arith.constant 0 : index
    %c0_4 = arith.constant 0 : index
    %3 = vector.load %arg3[%c0_3, %c0_4] : memref<16x4xbf16, #tpu.memory_space<vmem>>, vector<16x4xbf16>
    %cst_5 = arith.constant dense<0.000000e+00> : vector<16x392xf32>
    %4 = tpu.matmul %3, %0, %cst_5 {dimension_numbers = #tpu.dot_dimension_numbers<[1], [0], [0], [1], [0, 0, 1, 1], [], []>} : vector<16x4xbf16>, vector<4x392xbf16>, vector<16x392xf32> -> vector<16x392xf32>
    %5 = vector.extract_strided_slice %2 {offsets = [0, 0], sizes = [8, 392], strides = [1, 1]} : vector<32x392xf32> to vector<8x392xf32>
    %6 = vector.extract_strided_slice %2 {offsets = [8, 0], sizes = [8, 392], strides = [1, 1]} : vector<32x392xf32> to vector<8x392xf32>
    %7 = vector.extract_strided_slice %2 {offsets = [16, 0], sizes = [8, 392], strides = [1, 1]} : vector<32x392xf32> to vector<8x392xf32>
    %8 = vector.extract_strided_slice %2 {offsets = [24, 0], sizes = [8, 392], strides = [1, 1]} : vector<32x392xf32> to vector<8x392xf32>
    %9 = vector.extract_strided_slice %4 {offsets = [0, 0], sizes = [8, 392], strides = [1, 1]} : vector<16x392xf32> to vector<8x392xf32>
    %10 = vector.extract_strided_slice %4 {offsets = [8, 0], sizes = [8, 392], strides = [1, 1]} : vector<16x392xf32> to vector<8x392xf32>
    %11 = arith.mulf %5, %6 : vector<8x392xf32>
    %cst_6 = arith.constant dense<0.000000e+00> : vector<392xf32>
    %12 = vector.multi_reduction <add>, %11, %cst_6 [0] : vector<8x392xf32> to vector<392xf32>
    %13 = vector.shape_cast %12 : vector<392xf32> to vector<1x392xf32>
    %14 = arith.mulf %5, %8 : vector<8x392xf32>
    %cst_7 = arith.constant dense<0.000000e+00> : vector<392xf32>
    %15 = vector.multi_reduction <add>, %14, %cst_7 [0] : vector<8x392xf32> to vector<392xf32>
    %16 = vector.shape_cast %15 : vector<392xf32> to vector<1x392xf32>
    %17 = arith.mulf %7, %6 : vector<8x392xf32>
    %cst_8 = arith.constant dense<0.000000e+00> : vector<392xf32>
    %18 = vector.multi_reduction <add>, %17, %cst_8 [0] : vector<8x392xf32> to vector<392xf32>
    %19 = vector.shape_cast %18 : vector<392xf32> to vector<1x392xf32>
    %20 = arith.mulf %7, %8 : vector<8x392xf32>
    %cst_9 = arith.constant dense<0.000000e+00> : vector<392xf32>
    %21 = vector.multi_reduction <add>, %20, %cst_9 [0] : vector<8x392xf32> to vector<392xf32>
    %22 = vector.shape_cast %21 : vector<392xf32> to vector<1x392xf32>
    %23 = tpu.iota {dimensions = array<i32: 1>} : vector<1x392xi32>
    %c0_i32 = arith.constant 0 : i32
    %24 = vector.broadcast %c0_i32 : i32 to vector<1x392xi32>
    %25 = arith.cmpi sge, %23, %24 : vector<1x392xi32>
    %c196_i32 = arith.constant 196 : i32
    %26 = vector.broadcast %c196_i32 : i32 to vector<1x392xi32>
    %27 = arith.cmpi slt, %23, %26 : vector<1x392xi32>
    %28 = arith.andi %25, %27 : vector<1x392xi1>
    %c196_i32_10 = arith.constant 196 : i32
    %29 = vector.broadcast %c196_i32_10 : i32 to vector<1x392xi32>
    %30 = arith.cmpi sge, %23, %29 : vector<1x392xi32>
    %c392_i32 = arith.constant 392 : i32
    %31 = vector.broadcast %c392_i32 : i32 to vector<1x392xi32>
    %32 = arith.cmpi slt, %23, %31 : vector<1x392xi32>
    %33 = arith.andi %30, %32 : vector<1x392xi1>
    %34 = tpu.concatenate %13, %16 in 0 : vector<1x392xf32>, vector<1x392xf32> -> vector<2x392xf32>
    %cst_11 = arith.constant dense<0xFF800000> : vector<392xf32>
    %35 = vector.multi_reduction <maximumf>, %34, %cst_11 [0] : vector<2x392xf32> to vector<392xf32>
    %36 = vector.shape_cast %35 : vector<392xf32> to vector<1x392xf32>
    %cst_12 = arith.constant 0xFF800000 : f32
    %37 = vector.broadcast %cst_12 : f32 to vector<1x392xf32>
    %cst_13 = arith.constant 0xFF800000 : f32
    %38 = vector.broadcast %cst_13 : f32 to vector<1x392xf32>
    %39 = arith.select %28, %36, %38 : vector<1x392xi1>, vector<1x392xf32>
    %40 = vector.shape_cast %39 : vector<1x392xf32> to vector<1x1x392xf32>
    %cst_14 = arith.constant dense<0xFF800000> : vector<1xf32>
    %41 = vector.multi_reduction <maximumf>, %40, %cst_14 [1, 2] : vector<1x1x392xf32> to vector<1xf32>
    %42 = vector.shape_cast %41 : vector<1xf32> to vector<1x1x1xf32>
    %43 = vector.extract %42[0, 0, 0] : f32 from vector<1x1x1xf32>
    %44 = vector.broadcast %43 : f32 to vector<1x1xf32>
    %45 = vector.shape_cast %44 : vector<1x1xf32> to vector<1x1xf32>
    %46 = vector.broadcast %45 : vector<1x1xf32> to vector<1x392xf32>
    %47 = arith.select %28, %46, %37 : vector<1x392xi1>, vector<1x392xf32>
    %cst_15 = arith.constant 0xFF800000 : f32
    %48 = vector.broadcast %cst_15 : f32 to vector<1x392xf32>
    %49 = arith.select %33, %36, %48 : vector<1x392xi1>, vector<1x392xf32>
    %50 = vector.shape_cast %49 : vector<1x392xf32> to vector<1x1x392xf32>
    %cst_16 = arith.constant dense<0xFF800000> : vector<1xf32>
    %51 = vector.multi_reduction <maximumf>, %50, %cst_16 [1, 2] : vector<1x1x392xf32> to vector<1xf32>
    %52 = vector.shape_cast %51 : vector<1xf32> to vector<1x1x1xf32>
    %53 = vector.extract %52[0, 0, 0] : f32 from vector<1x1x1xf32>
    %54 = vector.broadcast %53 : f32 to vector<1x1xf32>
    %55 = vector.shape_cast %54 : vector<1x1xf32> to vector<1x1xf32>
    %56 = vector.broadcast %55 : vector<1x1xf32> to vector<1x392xf32>
    %57 = arith.select %33, %56, %47 : vector<1x392xi1>, vector<1x392xf32>
    %58 = vector.broadcast %57 : vector<1x392xf32> to vector<2x392xf32>
    %59 = arith.subf %34, %58 : vector<2x392xf32>
    %60 = math.exp %59 : vector<2x392xf32>
    %cst_17 = arith.constant dense<0.000000e+00> : vector<392xf32>
    %61 = vector.multi_reduction <add>, %60, %cst_17 [0] : vector<2x392xf32> to vector<392xf32>
    %62 = vector.shape_cast %61 : vector<392xf32> to vector<1x392xf32>
    %cst_18 = arith.constant 0.000000e+00 : f32
    %63 = vector.broadcast %cst_18 : f32 to vector<1x392xf32>
    %cst_19 = arith.constant 0.000000e+00 : f32
    %64 = vector.broadcast %cst_19 : f32 to vector<1x392xf32>
    %65 = arith.select %28, %62, %64 : vector<1x392xi1>, vector<1x392xf32>
    %66 = vector.shape_cast %65 : vector<1x392xf32> to vector<1x1x392xf32>
    %cst_20 = arith.constant dense<0.000000e+00> : vector<1xf32>
    %67 = vector.multi_reduction <add>, %66, %cst_20 [1, 2] : vector<1x1x392xf32> to vector<1xf32>
    %68 = vector.shape_cast %67 : vector<1xf32> to vector<1x1x1xf32>
    %69 = vector.extract %68[0, 0, 0] : f32 from vector<1x1x1xf32>
    %70 = vector.broadcast %69 : f32 to vector<1x1xf32>
    %71 = vector.shape_cast %70 : vector<1x1xf32> to vector<1x1xf32>
    %72 = vector.broadcast %71 : vector<1x1xf32> to vector<1x392xf32>
    %73 = arith.select %28, %72, %63 : vector<1x392xi1>, vector<1x392xf32>
    %cst_21 = arith.constant 0.000000e+00 : f32
    %74 = vector.broadcast %cst_21 : f32 to vector<1x392xf32>
    %75 = arith.select %33, %62, %74 : vector<1x392xi1>, vector<1x392xf32>
    %76 = vector.shape_cast %75 : vector<1x392xf32> to vector<1x1x392xf32>
    %cst_22 = arith.constant dense<0.000000e+00> : vector<1xf32>
    %77 = vector.multi_reduction <add>, %76, %cst_22 [1, 2] : vector<1x1x392xf32> to vector<1xf32>
    %78 = vector.shape_cast %77 : vector<1xf32> to vector<1x1x1xf32>
    %79 = vector.extract %78[0, 0, 0] : f32 from vector<1x1x1xf32>
    %80 = vector.broadcast %79 : f32 to vector<1x1xf32>
    %81 = vector.shape_cast %80 : vector<1x1xf32> to vector<1x1xf32>
    %82 = vector.broadcast %81 : vector<1x1xf32> to vector<1x392xf32>
    %83 = arith.select %33, %82, %73 : vector<1x392xi1>, vector<1x392xf32>
    %84 = tpu.reciprocal %83 {approx = true} : vector<1x392xf32> -> vector<1x392xf32>
    %85 = vector.broadcast %84 : vector<1x392xf32> to vector<2x392xf32>
    %86 = arith.mulf %60, %85 : vector<2x392xf32>
    %87 = vector.extract_strided_slice %86 {offsets = [0, 0], sizes = [1, 392], strides = [1, 1]} : vector<2x392xf32> to vector<1x392xf32>
    %88 = vector.extract_strided_slice %86 {offsets = [1, 0], sizes = [1, 392], strides = [1, 1]} : vector<2x392xf32> to vector<1x392xf32>
    %89 = tpu.concatenate %19, %22 in 0 : vector<1x392xf32>, vector<1x392xf32> -> vector<2x392xf32>
    %cst_23 = arith.constant dense<0xFF800000> : vector<392xf32>
    %90 = vector.multi_reduction <maximumf>, %89, %cst_23 [0] : vector<2x392xf32> to vector<392xf32>
    %91 = vector.shape_cast %90 : vector<392xf32> to vector<1x392xf32>
    %cst_24 = arith.constant 0xFF800000 : f32
    %92 = vector.broadcast %cst_24 : f32 to vector<1x392xf32>
    %cst_25 = arith.constant 0xFF800000 : f32
    %93 = vector.broadcast %cst_25 : f32 to vector<1x392xf32>
    %94 = arith.select %28, %91, %93 : vector<1x392xi1>, vector<1x392xf32>
    %95 = vector.shape_cast %94 : vector<1x392xf32> to vector<1x1x392xf32>
    %cst_26 = arith.constant dense<0xFF800000> : vector<1xf32>
    %96 = vector.multi_reduction <maximumf>, %95, %cst_26 [1, 2] : vector<1x1x392xf32> to vector<1xf32>
    %97 = vector.shape_cast %96 : vector<1xf32> to vector<1x1x1xf32>
    %98 = vector.extract %97[0, 0, 0] : f32 from vector<1x1x1xf32>
    %99 = vector.broadcast %98 : f32 to vector<1x1xf32>
    %100 = vector.shape_cast %99 : vector<1x1xf32> to vector<1x1xf32>
    %101 = vector.broadcast %100 : vector<1x1xf32> to vector<1x392xf32>
    %102 = arith.select %28, %101, %92 : vector<1x392xi1>, vector<1x392xf32>
    %cst_27 = arith.constant 0xFF800000 : f32
    %103 = vector.broadcast %cst_27 : f32 to vector<1x392xf32>
    %104 = arith.select %33, %91, %103 : vector<1x392xi1>, vector<1x392xf32>
    %105 = vector.shape_cast %104 : vector<1x392xf32> to vector<1x1x392xf32>
    %cst_28 = arith.constant dense<0xFF800000> : vector<1xf32>
    %106 = vector.multi_reduction <maximumf>, %105, %cst_28 [1, 2] : vector<1x1x392xf32> to vector<1xf32>
    %107 = vector.shape_cast %106 : vector<1xf32> to vector<1x1x1xf32>
    %108 = vector.extract %107[0, 0, 0] : f32 from vector<1x1x1xf32>
    %109 = vector.broadcast %108 : f32 to vector<1x1xf32>
    %110 = vector.shape_cast %109 : vector<1x1xf32> to vector<1x1xf32>
    %111 = vector.broadcast %110 : vector<1x1xf32> to vector<1x392xf32>
    %112 = arith.select %33, %111, %102 : vector<1x392xi1>, vector<1x392xf32>
    %113 = vector.broadcast %112 : vector<1x392xf32> to vector<2x392xf32>
    %114 = arith.subf %89, %113 : vector<2x392xf32>
    %115 = math.exp %114 : vector<2x392xf32>
    %cst_29 = arith.constant dense<0.000000e+00> : vector<392xf32>
    %116 = vector.multi_reduction <add>, %115, %cst_29 [0] : vector<2x392xf32> to vector<392xf32>
    %117 = vector.shape_cast %116 : vector<392xf32> to vector<1x392xf32>
    %cst_30 = arith.constant 0.000000e+00 : f32
    %118 = vector.broadcast %cst_30 : f32 to vector<1x392xf32>
    %cst_31 = arith.constant 0.000000e+00 : f32
    %119 = vector.broadcast %cst_31 : f32 to vector<1x392xf32>
    %120 = arith.select %28, %117, %119 : vector<1x392xi1>, vector<1x392xf32>
    %121 = vector.shape_cast %120 : vector<1x392xf32> to vector<1x1x392xf32>
    %cst_32 = arith.constant dense<0.000000e+00> : vector<1xf32>
    %122 = vector.multi_reduction <add>, %121, %cst_32 [1, 2] : vector<1x1x392xf32> to vector<1xf32>
    %123 = vector.shape_cast %122 : vector<1xf32> to vector<1x1x1xf32>
    %124 = vector.extract %123[0, 0, 0] : f32 from vector<1x1x1xf32>
    %125 = vector.broadcast %124 : f32 to vector<1x1xf32>
    %126 = vector.shape_cast %125 : vector<1x1xf32> to vector<1x1xf32>
    %127 = vector.broadcast %126 : vector<1x1xf32> to vector<1x392xf32>
    %128 = arith.select %28, %127, %118 : vector<1x392xi1>, vector<1x392xf32>
    %cst_33 = arith.constant 0.000000e+00 : f32
    %129 = vector.broadcast %cst_33 : f32 to vector<1x392xf32>
    %130 = arith.select %33, %117, %129 : vector<1x392xi1>, vector<1x392xf32>
    %131 = vector.shape_cast %130 : vector<1x392xf32> to vector<1x1x392xf32>
    %cst_34 = arith.constant dense<0.000000e+00> : vector<1xf32>
    %132 = vector.multi_reduction <add>, %131, %cst_34 [1, 2] : vector<1x1x392xf32> to vector<1xf32>
    %133 = vector.shape_cast %132 : vector<1xf32> to vector<1x1x1xf32>
    %134 = vector.extract %133[0, 0, 0] : f32 from vector<1x1x1xf32>
    %135 = vector.broadcast %134 : f32 to vector<1x1xf32>
    %136 = vector.shape_cast %135 : vector<1x1xf32> to vector<1x1xf32>
    %137 = vector.broadcast %136 : vector<1x1xf32> to vector<1x392xf32>
    %138 = arith.select %33, %137, %128 : vector<1x392xi1>, vector<1x392xf32>
    %139 = tpu.reciprocal %138 {approx = true} : vector<1x392xf32> -> vector<1x392xf32>
    %140 = vector.broadcast %139 : vector<1x392xf32> to vector<2x392xf32>
    %141 = arith.mulf %115, %140 : vector<2x392xf32>
    %142 = vector.extract_strided_slice %141 {offsets = [0, 0], sizes = [1, 392], strides = [1, 1]} : vector<2x392xf32> to vector<1x392xf32>
    %143 = vector.extract_strided_slice %141 {offsets = [1, 0], sizes = [1, 392], strides = [1, 1]} : vector<2x392xf32> to vector<1x392xf32>
    %144 = vector.broadcast %87 : vector<1x392xf32> to vector<8x392xf32>
    %145 = arith.mulf %144, %9 : vector<8x392xf32>
    %146 = vector.broadcast %88 : vector<1x392xf32> to vector<8x392xf32>
    %147 = arith.mulf %146, %10 : vector<8x392xf32>
    %148 = arith.addf %145, %147 : vector<8x392xf32>
    %149 = vector.broadcast %142 : vector<1x392xf32> to vector<8x392xf32>
    %150 = arith.mulf %149, %9 : vector<8x392xf32>
    %151 = vector.broadcast %143 : vector<1x392xf32> to vector<8x392xf32>
    %152 = arith.mulf %151, %10 : vector<8x392xf32>
    %153 = arith.addf %150, %152 : vector<8x392xf32>
    %154 = tpu.concatenate %148, %153 in 0 : vector<8x392xf32>, vector<8x392xf32> -> vector<16x392xf32>
    %155 = arith.truncf %154 : vector<16x392xf32> to vector<16x392xbf16>
    %c0_35 = arith.constant 0 : index
    %c0_36 = arith.constant 0 : index
    %156 = vector.load %arg4[%c0_35, %c0_36] : memref<16x392xbf16, #tpu.memory_space<vmem>>, vector<16x392xbf16>
    tpu.vector_store %arg4[%c0_35, %c0_36], %155 {strides = array<i32>} : memref<16x392xbf16, #tpu.memory_space<vmem>>, vector<16x392xbf16>,
    return
  }
  func.func @transform_0(%arg0: i32) -> (i32, i32) {
    %c0_i32 = arith.constant 0 : i32
    %c0_i32_0 = arith.constant 0 : i32
    return %c0_i32, %arg0 : i32, i32
  }
  func.func @transform_1(%arg0: i32) -> (i32, i32) {
    %c0_i32 = arith.constant 0 : i32
    %c0_i32_0 = arith.constant 0 : i32
    %c0_i32_1 = arith.constant 0 : i32
    return %c0_i32, %c0_i32_0 : i32, i32
  }
  func.func @transform_2(%arg0: i32) -> (i32, i32) {
    %c0_i32 = arith.constant 0 : i32
    %c0_i32_0 = arith.constant 0 : i32
    %c0_i32_1 = arith.constant 0 : i32
    return %c0_i32, %c0_i32_0 : i32, i32
  }
  func.func @transform_3(%arg0: i32) -> (i32, i32) {
    %c0_i32 = arith.constant 0 : i32
    %c0_i32_0 = arith.constant 0 : i32
    return %c0_i32, %arg0 : i32, i32
  }
}

</mosaic_0001>

<bundles_post_ra>
// kernel: tpu_custom_call.1
= control target key start
LH: loop header
LB: loop body
LE: loop exit
PB: predicated region body
PF: predicated region fallthrough
CT: control target
= control target key end

     0   :  { %v36_v1 = vlaneseq  ;;  %v981_v2 = vmov 1983009808   ;;  %v982_v4 = vmov 0   ;;  %s1308_s0 = inlined_call_operand.vmem [shape: bf16[4,392], index: 0, kind: input, shape index: {}]   ;;  %s1309_s1 = inlined_call_operand.vmem [shape: bf16[32,4], index: 1, kind: input, shape index: {}]   ;;  %s1310_s2 = inlined_call_operand.vmem [shape: bf16[16,4], index: 2, kind: input, shape index: {}]   ;;  %s1311_s3 = inlined_call_operand.hbm [shape: bf16[16,392], index: 3, kind: output, shape index: {}]  }
   0x1   :  { %v16_v0 = vld [vmem:[%s1308_s0] sm:$0xff]  ;;  %v34_v3 = vunpack.c.l.s4 %v981_v2  ;;  %101 = vmatprep.mubr.bf16.mxu0 %v982_v4  ;;  %154 = vmatprep.mubr.bf16.mxu1 %v982_v4 }
   0x2   :  { %v1010_v5 = vshrl.u32 %v36_v1, 7  ;;  %v32_v7 = vcombine.high %v16_v0, %v16_v0 }
   0x3   :  { %v35_v6 = vunpack.c.0.s8 %v34_v3 }
   0x4   :  { %8 = vsyncpa [#allocation3], 0  ;;  %vm56_vm0 = vcmask 1041408   ;;  %v922_v15 = vld [vmem:[%s1309_s1] sm:$0xff]   ;;  %vm49_vm1 = vcmask 31744   ;;  %v923_v16 = vld [vmem:[%s1309_s1 + $0x8] sm:$0xff]  }
   0x5   :  { %v38_v8 = vsub.s32 %v35_v6, %v1010_v5  ;;  %vm293_vm2 = vcmask 64512   ;;  %vm417_vm3 = vcmask 1040384   ;;  %vm443_vm4 = vcmask 58368   ;;  %s983_s25 = smov [#allocation2]  }
   0x6   :  { %vm532_vm8 = vcmask 57344   ;;  %vm857_vm9 = vcmask 1043456   ;;  %vm858_vm10 = vcmask 64516   ;;  %s868_s26 = sshll.u32 %s983_s25, 4  ;;  %s869_s26 = int_to_ptr.vmem [resolvable:$true] %s868_s26 }
   0x7   :  { %v39_v9 = vrot.slane %v16_v0, %v38_v8  ;;  %v46_v10 = vrot.slane %v32_v7, %v38_v8  ;;  %vm1249_vm11 = vmor %vm858_vm10, %vm857_vm9  ;;  %s957_s27 = scalar_lea.vmem %s869_s26, 512  ;;  %p962_p1 = scmp.lt.s32.totalorder %s869_s26, %s869_s26 }
   0x8   :  { %p958_p0 = scmp.ne.s32.totalorder %s869_s26, %s957_s27  ;;  %p963_p2 = scmp.lt.s32.totalorder %s957_s27, %s957_s27 }
   0x9   :  { %v47_v11 = vcombine.high %v39_v9, %v39_v9  ;;  %v48_v12 = vcombine.high %v46_v10, %v46_v10  ;;  %v58_v13 = vsel %vm56_vm0, %v39_v9, 0  ;;  %v64_v14 = vsel %vm56_vm0, %v46_v10, 0 }
   0xa   :  { %p964_p3 = por %p963_p2, %p962_p1 }
   0xb   :  { %881 = vmatprep.subr.msk.bf16.mxu0 %vm56_vm0, %v47_v11  ;;  %884 = vmatprep.subr.msk.bf16.mxu1 %vm56_vm0, %v48_v12 }
   0xc   :  { %70 = vmatpush1.bf16.msra.mxu0 %v58_v13  ;;  %123 = vmatpush1.bf16.msra.mxu1 %v64_v14  ;;  %p965_p4 = pnand %p964_p3, %p958_p0 }
   0xd   :  { %888 = vmatprep.subr.msk.bf16.mxu0 %vm56_vm0, %v47_v11  ;;  %890 = vmatprep.subr.msk.bf16.mxu1 %vm56_vm0, %v48_v12 }
   0xf   :  { %882 = vmatmul.mubr.msk.bf16.vlgmr.msra.gmra.mrb[0].mxu0 %vm49_vm1, %v922_v15  ;;  %885 = vmatmul.mubr.msk.bf16.vlgmr.msra.gmra.mrb[0].mxu1 %vm49_vm1, %v922_v15 }
  0x10   :  { %111 = vmatprep.mubr.bf16.mxu0 %v982_v4  ;;  %164 = vmatprep.mubr.bf16.mxu1 %v982_v4 }
  0x11   :  { %186 = vmatpush1.bf16.msra.mxu0 %v58_v13  ;;  %229 = vmatpush1.bf16.msra.mxu1 %v64_v14 }
  0x17   :  { %883 = vmatmul.mubr.msk.bf16.gmra.mrb[4].mxu0 %vm49_vm1, %v923_v16  ;;  %886 = vmatmul.mubr.msk.bf16.gmra.mrb[4].mxu1 %vm49_vm1, %v923_v16 }
  0x18   :  { %217 = vmatprep.mubr.bf16.mxu0 %v982_v4  ;;  %260 = vmatprep.mubr.bf16.mxu1 %v982_v4 }
  0xe2   :  { %v103_v17 = vpop.f32.mrb[0].mxu0  ;;  %v1029_v18 = vpop.f32.mrb[0].mxu1 }
  0xe3   :  { %v1031_v19 = vpop.f32.mrb[1].mxu0  ;;  %v1033_v20 = vpop.f32.mrb[1].mxu1 }
  0xe4   :  { %v107_v21 = vpop.f32.mrb[2].mxu0  ;;  %v160_v22 = vpop.f32.mrb[2].mxu1 }
  0xe5   :  { %v271_v23 = vmul.f32 %v107_v21, %v103_v17  ;;  %v273_v24 = vmul.f32 %v160_v22, %v1029_v18  ;;  %v109_v25 = vpop.f32.mrb[3].mxu0  ;;  %v162_v26 = vpop.f32.mrb[3].mxu1 }
  0xe6   :  { %v272_v27 = vmul.f32 %v109_v25, %v1031_v19  ;;  %v274_v28 = vmul.f32 %v162_v26, %v1033_v20 }
  0xe7   :  { %v275_v29 = vrot.slane %v271_v23, 4  ;;  %v287_v30 = vrot.slane %v273_v24, 4 }
  0xe8   :  { %v281_v31 = vrot.slane %v272_v27, 4  ;;  %v294_v32 = vsel %vm293_vm2, %v274_v28, 0.0 }
  0xe9   :  { %v276_v33 = vadd.f32 %v275_v29, %v271_v23  ;;  %v288_v34 = vadd.f32 %v287_v30, %v273_v24  ;;  %v295_v35 = vrot.slane %v294_v32, 4 }
  0xea   :  { %v282_v36 = vadd.f32 %v281_v31, %v272_v27  ;;  %v113_v37 = vpop.f32.mrb[4].mxu0  ;;  %v166_v38 = vpop.f32.mrb[4].mxu1 }
  0xeb   :  { %v277_v39 = vrot.slane %v276_v33, 2  ;;  %v289_v40 = vrot.slane %v288_v34, 2  ;;  %v296_v41 = vadd.f32 %v295_v35, %v294_v32  ;;  %v330_v42 = vmul.f32 %v113_v37, %v107_v21  ;;  %v115_v43 = vpop.f32.mrb[5].mxu0  ;;  %v1039_v44 = vpop.f32.mrb[5].mxu1 }
  0xec   :  { %v283_v45 = vrot.slane %v282_v36, 2  ;;  %v332_v46 = vmul.f32 %v166_v38, %v160_v22  ;;  %v331_v47 = vmul.f32 %v115_v43, %v109_v25  ;;  %v333_v48 = vmul.f32 %v1039_v44, %v162_v26  ;;  %v117_v49 = vpop.f32.mrb[6].mxu0  ;;  %v170_v50 = vpop.f32.mrb[6].mxu1 }
  0xed   :  { %v278_v51 = vadd.f32 %v277_v39, %v276_v33  ;;  %v290_v52 = vadd.f32 %v289_v40, %v288_v34  ;;  %v297_v53 = vrot.slane %v296_v41, 2  ;;  %v334_v54 = vrot.slane %v330_v42, 4  ;;  %v119_v55 = vpop.f32.mrb[7].mxu0  ;;  %v172_v56 = vpop.f32.mrb[7].mxu1 }
  0xee   :  { %v284_v57 = vadd.f32 %v283_v45, %v282_v36  ;;  %v346_v58 = vrot.slane %v332_v46, 4  ;;  %v340_v59 = vrot.slane %v331_v47, 4  ;;  %v352_v60 = vsel %vm293_vm2, %v333_v48, 0.0 }
  0xef   :  { %v279_v61 = vrot.slane %v278_v51, 1  ;;  %v291_v62 = vrot.slane %v290_v52, 1  ;;  %v335_v63 = vadd.f32 %v334_v54, %v330_v42  ;;  %v353_v3 = vrot.slane %v352_v60, 4 }
  0xf0   :  { %v347_v0 = vadd.f32 %v346_v58, %v332_v46  ;;  %v341_v2 = vadd.f32 %v340_v59, %v331_v47  ;;  %v285_v4 = vrot.slane %v284_v57, 1  ;;  %v1043_v6 = vadd.f32 %v297_v53, %v296_v41 }
  0xf1   :  { %v336_v7 = vrot.slane %v335_v63, 2  ;;  %v1045_v8 = vadd.f32 %v279_v61, %v278_v51  ;;  %v354_v11 = vadd.f32 %v353_v3, %v352_v60  ;;  %v1047_v12 = vadd.f32 %v291_v62, %v290_v52 }
  0xf2   :  { %v348_v9 = vrot.slane %v347_v0, 2  ;;  %v342_v10 = vrot.slane %v341_v2, 2  ;;  %v301_v14 = vmul.f32 %v117_v49, %v103_v17  ;;  %v359_v15 = vmul.f32 %v117_v49, %v113_v37 }
  0xf3   :  { %v337_v13 = vadd.f32 %v336_v7, %v335_v63  ;;  %v355_v22 = vrot.slane %v354_v11, 2  ;;  %v303_v23 = vmul.f32 %v170_v50, %v1029_v18  ;;  %v361_v27 = vmul.f32 %v170_v50, %v166_v38 }
  0xf4   :  { %v349_v16 = vadd.f32 %v348_v9, %v347_v0  ;;  %v343_v21 = vadd.f32 %v342_v10, %v341_v2  ;;  %v305_v25 = vrot.slane %v301_v14, 4  ;;  %v363_v26 = vrot.slane %v359_v15, 4 }
  0xf5   :  { %v338_v24 = vrot.slane %v337_v13, 1  ;;  %v299_v28 = vrot.slane %v1043_v6, 1  ;;  %v317_v31 = vrot.slane %v303_v23, 4  ;;  %v1051_v32 = vadd.f32 %v285_v4, %v284_v57 }
  0xf6   :  { %v350_v29 = vrot.slane %v349_v16, 1  ;;  %v344_v30 = vrot.slane %v343_v21, 1  ;;  %v306_v33 = vadd.f32 %v305_v25, %v301_v14  ;;  %v364_v17 = vadd.f32 %v363_v26, %v359_v15 }
  0xf7   :  { %v375_v34 = vrot.slane %v361_v27, 4  ;;  %v339_v35 = vadd.f32 %v338_v24, %v337_v13  ;;  %v1053_v37 = vadd.f32 %v355_v22, %v354_v11  ;;  %v318_v18 = vadd.f32 %v317_v31, %v303_v23 }
  0xf8   :  { %v351_v36 = vadd.f32 %v350_v29, %v349_v16  ;;  %v307_v39 = vrot.slane %v306_v33, 2  ;;  %v365_v40 = vrot.slane %v364_v17, 2  ;;  %v302_v38 = vmul.f32 %v119_v55, %v1031_v19 }
  0xf9   :  { %v376_v41 = vadd.f32 %v375_v34, %v361_v27  ;;  %v345_v42 = vadd.f32 %v344_v30, %v343_v21  ;;  %v319_v45 = vrot.slane %v318_v18, 2  ;;  %v360_v46 = vmul.f32 %v119_v55, %v115_v43 }
  0xfa   :  { %v304_v47 = vmul.f32 %v172_v56, %v1033_v20  ;;  %v308_v48 = vadd.f32 %v307_v39, %v306_v33  ;;  %v366_v49 = vadd.f32 %v365_v40, %v364_v17  ;;  %v311_v51 = vrot.slane %v302_v38, 4 }
  0xfb   :  { %v377_v50 = vrot.slane %v376_v41, 2  ;;  %v320_v52 = vadd.f32 %v319_v45, %v318_v18  ;;  %v369_v53 = vrot.slane %v360_v46, 4  ;;  %v362_v57 = vmul.f32 %v172_v56, %v1039_v44 }
  0xfc   :  { %v323_v54 = vsel %vm293_vm2, %v304_v47, 0.0  ;;  %v309_v58 = vrot.slane %v308_v48, 1  ;;  %v367_v59 = vrot.slane %v366_v49, 1  ;;  %v312_v61 = vadd.f32 %v311_v51, %v302_v38 }
  0xfd   :  { %v378_v60 = vadd.f32 %v377_v50, %v376_v41  ;;  %v321_v19 = vrot.slane %v320_v52, 1  ;;  %v370_v62 = vadd.f32 %v369_v53, %v360_v46  ;;  %v324_v63 = vrot.slane %v323_v54, 4 }
  0xfe   :  { %v381_v43 = vsel %vm293_vm2, %v362_v57, 0.0  ;;  %v310_v20 = vadd.f32 %v309_v58, %v308_v48  ;;  %v368_v55 = vadd.f32 %v367_v59, %v366_v49  ;;  %v313_v2 = vrot.slane %v312_v61, 2 }
  0xff   :  { %v379_v0 = vrot.slane %v378_v60, 1  ;;  %v322_v3 = vadd.f32 %v321_v19, %v320_v52  ;;  %v371_v4 = vrot.slane %v370_v62, 2  ;;  %v325_v7 = vadd.f32 %v324_v63, %v323_v54 }
 0x100   :  { %v382_v9 = vrot.slane %v381_v43, 4  ;;  %v314_v44 = vadd.f32 %v313_v2, %v312_v61  ;;  %v1062_v56 = vsel %vm417_vm3, %v1045_v8, %v310_v20  ;;  %v1065_v11 = vsel %vm417_vm3, %v339_v35, %v368_v55 }
 0x101   :  { %v380_v10 = vadd.f32 %v379_v0, %v378_v60  ;;  %v372_v13 = vadd.f32 %v371_v4, %v370_v62  ;;  %v326_v14 = vrot.slane %v325_v7, 2  ;;  %v422_v16 = vsel %vm56_vm0, %v1062_v56, -inf }
 0x102   :  { %v383_v15 = vadd.f32 %v382_v9, %v381_v43  ;;  %v357_v21 = vrot.slane %v1053_v37, 1  ;;  %v315_v22 = vrot.slane %v314_v44, 1  ;;  %v423_v23 = vrot.slane %v422_v16, 4 }
 0x103   :  { %v1072_v24 = vsel %vm417_vm3, %v1047_v12, %v322_v3  ;;  %v373_v25 = vrot.slane %v372_v13, 1  ;;  %v327_v8 = vadd.f32 %v326_v14, %v325_v7  ;;  %v586_v33 = vsel %vm56_vm0, %v1065_v11, -inf }
 0x104   :  { %v384_v26 = vrot.slane %v383_v15, 2  ;;  %v436_v27 = vsel %vm56_vm0, %v1072_v24, -inf  ;;  %v316_v29 = vadd.f32 %v315_v22, %v314_v44  ;;  %v424_v30 = vmax.f32 %v422_v16, %v423_v23 }
 0x105   :  { %v437_v31 = vrot.slane %v436_v27, 4  ;;  %v374_v17 = vadd.f32 %v373_v25, %v372_v13  ;;  %v328_v34 = vrot.slane %v327_v8, 1  ;;  %v1079_v18 = vsel %vm417_vm3, %v351_v36, %v380_v10 }
 0x106   :  { %v385_v35 = vadd.f32 %v384_v26, %v383_v15  ;;  %v300_v12 = vadd.f32 %v299_v28, %v1043_v6  ;;  %v1086_v39 = vsel %vm417_vm3, %v1051_v32, %v316_v29  ;;  %v425_v40 = vrot.slane %v424_v30, 2 }
 0x107   :  { %v438_v41 = vmax.f32 %v436_v27, %v437_v31  ;;  %v329_v38 = vadd.f32 %v328_v34, %v327_v8  ;;  %v429_v46 = vsel %vm56_vm0, %v1086_v39, -inf  ;;  %v1091_v47 = vsel %vm417_vm3, %v345_v42, %v374_v17 }
 0x108   :  { %v386_v45 = vrot.slane %v385_v35, 1  ;;  %v389_v36 = vand.u32 127, %v36_v1  ;;  %v358_v48 = vadd.f32 %v357_v21, %v1053_v37  ;;  %v430_v49 = vrot.slane %v429_v46, 4 }
 0x109   :  { %v587_v6 = vrot.slane %v586_v33, 4  ;;  %v1096_v32 = vsel %vm417_vm3, %v300_v12, %v329_v38  ;;  %v593_v50 = vsel %vm56_vm0, %v1091_v47, -inf  ;;  %v600_v51 = vsel %vm56_vm0, %v1079_v18, -inf }
 0x10a   :  { %v387_v28 = vadd.f32 %v386_v45, %v385_v35  ;;  %v426_v52 = vmax.f32 %v424_v30, %v425_v40  ;;  %v431_v53 = vmax.f32 %v429_v46, %v430_v49  ;;  %v444_v42 = vsel %vm443_vm4, %v1096_v32, -inf }
 0x10b   :  { %v439_v37 = vrot.slane %v438_v41, 2  ;;  %v445_v54 = vrot.slane %v444_v42, 4  ;;  %v594_v57 = vrot.slane %v593_v50, 4  ;;  %v1107_v58 = vadd.s32 128, %v389_v36 }
 0x10c   :  { %v1105_v1 = vsel %vm417_vm3, %v358_v48, %v387_v28  ;;  %v432_v59 = vrot.slane %v431_v53, 2  ;;  %v601_v60 = vrot.slane %v600_v51, 4  ;;  %v588_v19 = vmax.f32 %v586_v33, %v587_v6 }
 0x10d   :  { %v446_v61 = vmax.f32 %v444_v42, %v445_v54  ;;  %v595_v62 = vmax.f32 %v593_v50, %v594_v57  ;;  %v607_v63 = vsel %vm443_vm4, %v1105_v1, -inf  ;;  %v427_v0 = vrot.slane %v426_v52, 1  ;;  %v924_v54 = vld [vmem:[%s1310_s2] sm:$0xff]  }
 0x10e   :  { %v433_v43 = vmax.f32 %v431_v53, %v432_v59  ;;  %v602_v20 = vmax.f32 %v600_v51, %v601_v60  ;;  %v608_v55 = vrot.slane %v607_v63, 4  ;;  %v440_v2 = vmax.f32 %v438_v41, %v439_v37  ;;  %889 = vmatmul.mubr.msk.bf16.vlgmr.msra.gmra.mrb[8].mxu0 %vm49_vm1, %v924_v54  ;;  %891 = vmatmul.mubr.msk.bf16.vlgmr.msra.gmra.mrb[8].mxu1 %vm49_vm1, %v924_v54 }
 0x10f   :  { %v447_v3 = vrot.slane %v446_v61, 2  ;;  %v596_v4 = vrot.slane %v595_v62, 2  ;;  %v1111_v7 = vadd.s32 384, %v389_v36  ;;  %vm398_vm5 = vcmp.lt.s32.totalorder %v1107_v58, 196 }
 0x110   :  { %v434_v9 = vrot.slane %v433_v43, 1  ;;  %v603_v10 = vrot.slane %v602_v20, 2  ;;  %v609_v44 = vmax.f32 %v607_v63, %v608_v55  ;;  %v589_v14 = vrot.slane %v588_v19, 2 }
 0x111   :  { %v448_v13 = vmax.f32 %v446_v61, %v447_v3  ;;  %v597_v15 = vmax.f32 %v595_v62, %v596_v4  ;;  %v428_v23 = vmax.f32 %v426_v52, %v427_v0  ;;  %v441_v25 = vrot.slane %v440_v2, 1 }
 0x112   :  { %v435_v16 = vmax.f32 %v433_v43, %v434_v9  ;;  %v604_v21 = vmax.f32 %v602_v20, %v603_v10  ;;  %v610_v22 = vrot.slane %v609_v44, 2  ;;  %vm412_vm6 = vcmp.lt.s32.totalorder %v1111_v7, 392 }
 0x113   :  { %v449_v8 = vrot.slane %v448_v13, 1  ;;  %v598_v27 = vrot.slane %v597_v15, 1  ;;  %v590_v33 = vmax.f32 %v588_v19, %v589_v14  ;;  %vm406_vm7 = vcmp.ge.s32.totalorder %v1107_v58, 196 }
 0x114   :  { %v452_v26 = vsel %vm398_vm5, %v435_v16, -inf  ;;  %v611_v29 = vmax.f32 %v609_v44, %v610_v22  ;;  %v605_v17 = vrot.slane %v604_v21, 1  ;;  %v442_v35 = vmax.f32 %v440_v2, %v441_v25 }
 0x115   :  { %v456_v30 = vmax.f32 %v428_v23, %v452_v26  ;;  %v450_v31 = vmax.f32 %v448_v13, %v449_v8  ;;  %v599_v41 = vmax.f32 %v597_v15, %v598_v27  ;;  %v591_v46 = vrot.slane %v590_v33, 1 }
 0x116   :  { %v612_v34 = vrot.slane %v611_v29, 1  ;;  %v468_v36 = vsel %vm406_vm7, %v435_v16, -inf  ;;  %v606_v48 = vmax.f32 %v604_v21, %v605_v17 }
 0x117   :  { %459 = vmax.xlane.f32.xlu0 %v456_v30  ;;  %v470_v12 = vsel %vm412_vm6, %v450_v31, -inf  ;;  %v615_v50 = vsel %vm398_vm5, %v599_v41, -inf  ;;  %v592_v52 = vmax.f32 %v590_v33, %v591_v46  ;;  %v631_v53 = vsel %vm406_vm7, %v599_v41, -inf }
 0x118   :  { %v471_v40 = vsel %vm293_vm2, %v470_v12, -inf  ;;  %v613_v38 = vmax.f32 %v611_v29, %v612_v34 }
 0x119   :  { %v473_v45 = vmax.f32 %v442_v35, %v471_v40  ;;  %v619_v37 = vmax.f32 %v592_v52, %v615_v50 }
 0x11a   :  { %v633_v49 = vsel %vm412_vm6, %v613_v38, -inf }
 0x11b   :  { %v474_v6 = vmax.f32 %v468_v36, %v473_v45  ;;  %v634_v28 = vsel %vm293_vm2, %v633_v49, -inf }
 0x11c   :  { %v636_v51 = vmax.f32 %v606_v48, %v634_v28 }
 0x11d   :  { %475 = vmax.xlane.f32.xlu0 %v474_v6 }
 0x11e   :  { %v1130_v42 = vmax.f32 %v631_v53, %v636_v51 }
 0x121   :  { %622 = vmax.xlane.f32.xlu0 %v619_v37 }
 0x1a4   :  { %v460_v57 = vpop.xlane.xlu0 %459 }
 0x1a5   :  { %900 = vpush %v460_v57 }
 0x1aa   :  { %v476_v59 = vpop.xlane.xlu0 %475 }
 0x1ab   :  { %902 = vpush %v476_v59 }
 0x1d6   :  { %s901_s18 = spop %900 }
 0x1d7   :  { %v462_v60 = vstv %s901_s18 }
 0x1d8   :  { %v483_v61 = vsub.f32 %v1062_v56, %v462_v60  ;;  %v464_v62 = vsel %vm398_vm5, %v462_v60, -inf }
 0x1da   :  { %v487_v19 = vmul.f32 1.442695, %v483_v61 }
 0x1dc   :  { %925 = vpow2.f32 %v487_v19  ;;  %s903_s19 = spop %902 }
 0x1dd   :  { %v478_v63 = vstv %s903_s19 }
 0x1de   :  { %v480_v43 = vsel %vm406_vm7, %v478_v63, %v464_v62  ;;  %v482_v20 = vsel %vm412_vm6, %v478_v63, -inf  ;;  %v485_v55 = vsub.f32 %v1072_v24, %v478_v63 }
 0x1df   :  { %v484_v0 = vsub.f32 %v1086_v39, %v480_v43  ;;  %v486_v2 = vsub.f32 %v1096_v32, %v482_v20 }
 0x1e0   :  { %v491_v56 = vmul.f32 1.442695, %v485_v55 }
 0x1e1   :  { %v489_v3 = vmul.f32 1.442695, %v484_v0  ;;  %v493_v4 = vmul.f32 1.442695, %v486_v2  ;;  %v1175_v60 = vpop.f32.mrb[8].mxu0  ;;  %v1181_v62 = vpop.f32.mrb[8].mxu1 }
 0x1e2   :  { %927 = vpow2.f32 %v491_v56  ;;  %v1177_v61 = vpop.f32.mrb[9].mxu0  ;;  %v1183_v63 = vpop.f32.mrb[9].mxu1 }
 0x1e3   :  { %929 = vpow2.f32 %v489_v3  ;;  %v1179_v19 = vpop.f32.mrb[10].mxu0  ;;  %v1185_v43 = vpop.f32.mrb[10].mxu1 }
 0x1e4   :  { %931 = vpow2.f32 %v493_v4  ;;  %v1187_v20 = vpop.f32.mrb[11].mxu0  ;;  %v1189_v55 = vpop.f32.mrb[11].mxu1 }
 0x1e6   :  { %v1147_v9 = vpop.eup %925 }
 0x1e7   :  { %v495_v10 = vsel %vm56_vm0, %v1147_v9, 0.0 }
 0x1e8   :  { %v496_v44 = vrot.slane %v495_v10, 4 }
 0x1ea   :  { %v497_v13 = vadd.f32 %v496_v44, %v495_v10 }
 0x1ec   :  { %v1151_v14 = vpop.eup %927  ;;  %v498_v24 = vrot.slane %v497_v13, 2 }
 0x1ed   :  { %v1153_v15 = vpop.eup %929  ;;  %v509_v39 = vsel %vm56_vm0, %v1151_v14, 0.0 }
 0x1ee   :  { %v1157_v32 = vpop.eup %931  ;;  %v502_v16 = vsel %vm56_vm0, %v1153_v15, 0.0  ;;  %v510_v21 = vrot.slane %v509_v39, 4  ;;  %v499_v25 = vadd.f32 %v498_v24, %v497_v13 }
 0x1ef   :  { %v503_v22 = vrot.slane %v502_v16, 4  ;;  %v516_v23 = vsel %vm443_vm4, %v1157_v32, 0.0 }
 0x1f0   :  { %v511_v8 = vadd.f32 %v510_v21, %v509_v39  ;;  %v517_v26 = vrot.slane %v516_v23, 4  ;;  %v500_v33 = vrot.slane %v499_v25, 1 }
 0x1f1   :  { %v504_v27 = vadd.f32 %v503_v22, %v502_v16 }
 0x1f2   :  { %v512_v29 = vrot.slane %v511_v8, 2  ;;  %v518_v30 = vadd.f32 %v517_v26, %v516_v23  ;;  %v501_v38 = vadd.f32 %v500_v33, %v499_v25  ;;  %v623_v23 = vpop.xlane.xlu0 %622 }
 0x1f3   :  { %v505_v31 = vrot.slane %v504_v27, 2 }
 0x1f4   :  { %v513_v17 = vadd.f32 %v512_v29, %v511_v8  ;;  %v519_v34 = vrot.slane %v518_v30, 2  ;;  %v527_v28 = vsel %vm417_vm3, %v501_v38, 0.0 }
 0x1f5   :  { %v506_v35 = vadd.f32 %v505_v31, %v504_v27 }
 0x1f6   :  { %v514_v12 = vrot.slane %v513_v17, 1  ;;  %v520_v40 = vadd.f32 %v519_v34, %v518_v30 }
 0x1f7   :  { %v507_v41 = vrot.slane %v506_v35, 1 }
 0x1f8   :  { %v515_v45 = vadd.f32 %v514_v12, %v513_v17  ;;  %v521_v46 = vrot.slane %v520_v40, 1 }
 0x1f9   :  { %v508_v36 = vadd.f32 %v507_v41, %v506_v35 }
 0x1fa   :  { %v522_v48 = vadd.f32 %v521_v46, %v520_v40  ;;  %v556_v52 = vsel %vm417_vm3, %v515_v45, 0.0  ;;  %v1208_v46 = vsub.s32 0, %v1010_v5 }
 0x1fb   :  { %v524_v49 = vsel %vm398_vm5, %v508_v36, 0.0  ;;  %v550_v6 = vsel %vm406_vm7, %v508_v36, 0.0 }
 0x1fc   :  { %v528_v50 = vsel %vm417_vm3, %v524_v49, 0.0  ;;  %v554_v51 = vsel %vm417_vm3, %v550_v6, 0.0  ;;  %v552_v37 = vsel %vm412_vm6, %v522_v48, 0.0 }
 0x1fd   :  { %v529_v53 = vadd.f32 %v528_v50, %v527_v28  ;;  %v557_v54 = vadd.f32 %v556_v52, %v554_v51  ;;  %v558_v57 = vsel %vm532_vm8, %v552_v37, 0.0 }
 0x1ff   :  { %535 = vadd.xlane.f32.xlu1 %v529_v53  ;;  %v559_v59 = vadd.f32 %v558_v57, %v557_v54 }
 0x203   :  { %560 = vadd.xlane.f32.xlu1 %v559_v59 }
 0x207   :  { %638 = vmax.xlane.f32.xlu1 %v1130_v42 }
 0x28c   :  { %v536_v0 = vpop.xlane.xlu1 %535 }
 0x28d   :  { %v537_v2 = vrot.slane %v536_v0, 4 }
 0x28f   :  { %v538_v56 = vadd.f32 %v537_v2, %v536_v0 }
 0x290   :  { %v561_v42 = vpop.xlane.xlu1 %560 }
 0x291   :  { %v539_v3 = vrot.slane %v538_v56, 2  ;;  %v562_v4 = vrot.slane %v561_v42, 4 }
 0x293   :  { %v563_v10 = vadd.f32 %v562_v4, %v561_v42  ;;  %v540_v44 = vadd.f32 %v539_v3, %v538_v56 }
 0x294   :  { %v639_v25 = vpop.xlane.xlu1 %638 }
 0x295   :  { %v564_v13 = vrot.slane %v563_v10, 2  ;;  %v541_v24 = vrot.slane %v540_v44, 1 }
 0x297   :  { %v542_v39 = vadd.f32 %v541_v24, %v540_v44  ;;  %v565_v16 = vadd.f32 %v564_v13, %v563_v10 }
 0x299   :  { %904 = vpush %v542_v39  ;;  %v566_v21 = vrot.slane %v565_v16, 1 }
 0x29b   :  { %v567_v22 = vadd.f32 %v566_v21, %v565_v16 }
 0x29d   :  { %906 = vpush %v567_v22 }
 0x29e   :  { %908 = vpush %v623_v23 }
 0x29f   :  { %910 = vpush %v639_v25 }
 0x2ca   :  { %s905_s2 = spop %904 }
 0x2cb   :  { %v544_v8 = vstv %s905_s2 }
 0x2cc   :  { %933 = vrcp.f32 %v544_v8  ;;  %v546_v26 = vsel %vm398_vm5, %v544_v8, 0.0 }
 0x2ce   :  { %s907_s20 = spop %906 }
 0x2cf   :  { %v569_v27 = vstv %s907_s20  ;;  %s909_s21 = spop %908 }
 0x2d0   :  { %v571_v29 = vsel %vm406_vm7, %v569_v27, %v546_v26  ;;  %v573_v30 = vsel %vm412_vm6, %v569_v27, 0.0  ;;  %935 = vrcp.f32 %v569_v27  ;;  %v625_v31 = vstv %s909_s21  ;;  %s911_s22 = spop %910 }
 0x2d1   :  { %937 = vrcp.f32 %v571_v29  ;;  %v627_v33 = vsel %vm398_vm5, %v625_v31, -inf  ;;  %v646_v17 = vsub.f32 %v1065_v11, %v625_v31  ;;  %v641_v34 = vstv %s911_s22 }
 0x2d2   :  { %939 = vrcp.f32 %v573_v30  ;;  %v643_v35 = vsel %vm406_vm7, %v641_v34, %v627_v33  ;;  %v645_v12 = vsel %vm412_vm6, %v641_v34, -inf  ;;  %v648_v40 = vsub.f32 %v1079_v18, %v641_v34 }
 0x2d3   :  { %v650_v41 = vmul.f32 1.442695, %v646_v17  ;;  %v647_v38 = vsub.f32 %v1091_v47, %v643_v35  ;;  %v649_v45 = vsub.f32 %v1105_v1, %v645_v12  ;;  %v1211_v11 = vsub.s32 1, %v1010_v5 }
 0x2d4   :  { %v654_v36 = vmul.f32 1.442695, %v648_v40 }
 0x2d5   :  { %941 = vpow2.f32 %v650_v41  ;;  %v652_v48 = vmul.f32 1.442695, %v647_v38  ;;  %v656_v49 = vmul.f32 1.442695, %v649_v45 }
 0x2d6   :  { %v934_v6 = vpop.eup %933  ;;  %943 = vpow2.f32 %v654_v36 }
 0x2d7   :  { %945 = vpow2.f32 %v652_v48  ;;  %v578_v18 = vmul.f32 %v934_v6, %v1147_v9 }
 0x2d8   :  { %947 = vpow2.f32 %v656_v49 }
 0x2d9   :  { %v747_v47 = vrot.slane %v578_v18, %v1208_v46  ;;  %v767_v1 = vrot.slane %v578_v18, %v1211_v11 }
 0x2da   :  { %v936_v28 = vpop.eup %935 }
 0x2db   :  { %v938_v50 = vpop.eup %937  ;;  %v760_v51 = vmul.f32 %v747_v47, %v1175_v60  ;;  %v780_v5 = vmul.f32 %v767_v1, %v1179_v19  ;;  %v580_v52 = vmul.f32 %v936_v28, %v1151_v14 }
 0x2dc   :  { %v940_v53 = vpop.eup %939  ;;  %v579_v37 = vmul.f32 %v938_v50, %v1153_v15 }
 0x2dd   :  { %v784_v54 = vadd.f32 %v780_v5, %v760_v51  ;;  %v755_v57 = vrot.slane %v580_v52, %v1208_v46  ;;  %v581_v9 = vmul.f32 %v940_v53, %v1157_v32  ;;  %v775_v59 = vrot.slane %v580_v52, %v1211_v11 }
 0x2de   :  { %v751_v0 = vrot.slane %v579_v37, %v1208_v46  ;;  %v771_v2 = vrot.slane %v579_v37, %v1211_v11 }
 0x2df   :  { %v1225_v56 = vpop.eup %941  ;;  %v762_v42 = vmul.f32 %v755_v57, %v1181_v62  ;;  %v759_v14 = vrot.slane %v581_v9, %v1208_v46  ;;  %v782_v15 = vmul.f32 %v775_v59, %v1185_v43  ;;  %v779_v3 = vrot.slane %v581_v9, %v1211_v11 }
 0x2e0   :  { %v1231_v4 = vpop.eup %943  ;;  %v761_v32 = vmul.f32 %v751_v0, %v1177_v61  ;;  %v781_v10 = vmul.f32 %v771_v2, %v1187_v20  ;;  %v658_v44 = vsel %vm56_vm0, %v1225_v56, 0.0 }
 0x2e1   :  { %v1237_v13 = vpop.eup %945  ;;  %v763_v24 = vmul.f32 %v759_v14, %v1183_v63  ;;  %v786_v39 = vadd.f32 %v782_v15, %v762_v42  ;;  %v783_v16 = vmul.f32 %v779_v3, %v1189_v55  ;;  %v659_v21 = vrot.slane %v658_v44, 4 }
 0x2e2   :  { %v1241_v22 = vpop.eup %947  ;;  %v785_v23 = vadd.f32 %v781_v10, %v761_v32  ;;  %v665_v25 = vsel %vm56_vm0, %v1237_v13, 0.0  ;;  %v672_v8 = vsel %vm56_vm0, %v1231_v4, 0.0 }
 0x2e3   :  { %v787_v26 = vadd.f32 %v783_v16, %v763_v24  ;;  %v660_v27 = vadd.f32 %v659_v21, %v658_v44  ;;  %v666_v29 = vrot.slane %v665_v25, 4  ;;  %v673_v30 = vrot.slane %v672_v8, 4 }
 0x2e4   :  { %v896_v31 = vpack.c.bf16 %v785_v23, %v784_v54  ;;  %v679_v17 = vsel %vm443_vm4, %v1241_v22, 0.0 }
 0x2e5   :  { %v897_v34 = vpack.c.bf16 %v787_v26, %v786_v39  ;;  %v661_v35 = vrot.slane %v660_v27, 2  ;;  %v667_v12 = vadd.f32 %v666_v29, %v665_v25  ;;  %v674_v40 = vadd.f32 %v673_v30, %v672_v8 }
 0x2e6   :  { %856 = vst [vmem:[#allocation2] sm:$0xff] %v896_v31  ;;  %v680_v41 = vrot.slane %v679_v17, 4 }
 0x2e7   :  { %860 = vst.msk [vmem:[#allocation2 + $0x8] sm:$0xff] %vm1249_vm11, %v897_v34  ;;  %v662_v38 = vadd.f32 %v661_v35, %v660_v27  ;;  %v668_v45 = vrot.slane %v667_v12, 2  ;;  %v675_v36 = vrot.slane %v674_v40, 2 }
 0x2e8   :  { %v681_v48 = vadd.f32 %v680_v41, %v679_v17 }
 0x2e9   :  { %v663_v49 = vrot.slane %v662_v38, 1  ;;  %v669_v6 = vadd.f32 %v668_v45, %v667_v12  ;;  %v676_v18 = vadd.f32 %v675_v36, %v674_v40 }
 0x2ea   :  { %v682_v47 = vrot.slane %v681_v48, 2 }
 0x2eb   :  { %v664_v1 = vadd.f32 %v663_v49, %v662_v38  ;;  %v670_v28 = vrot.slane %v669_v6, 1  ;;  %v677_v50 = vrot.slane %v676_v18, 1 }
 0x2ec   :  { %v683_v51 = vadd.f32 %v682_v47, %v681_v48 }
 0x2ed   :  { %v671_v5 = vadd.f32 %v670_v28, %v669_v6  ;;  %v678_v52 = vadd.f32 %v677_v50, %v676_v18  ;;  %v690_v54 = vsel %vm417_vm3, %v664_v1, 0.0 }
 0x2ee   :  { %v684_v53 = vrot.slane %v683_v51, 1 }
 0x2ef   :  { %v687_v37 = vsel %vm398_vm5, %v671_v5, 0.0  ;;  %v712_v57 = vsel %vm406_vm7, %v671_v5, 0.0  ;;  %v718_v2 = vsel %vm417_vm3, %v678_v52, 0.0 }
 0x2f0   :  { %v691_v9 = vsel %vm417_vm3, %v687_v37, 0.0  ;;  %v685_v59 = vadd.f32 %v684_v53, %v683_v51  ;;  %v716_v0 = vsel %vm417_vm3, %v712_v57, 0.0 }
 0x2f1   :  { %v692_v42 = vadd.f32 %v691_v9, %v690_v54  ;;  %v719_v14 = vadd.f32 %v718_v2, %v716_v0 }
 0x2f2   :  { %v714_v15 = vsel %vm412_vm6, %v685_v59, 0.0 }
 0x2f3   :  { %697 = vadd.xlane.f32.xlu0 %v692_v42  ;;  %v720_v3 = vsel %vm532_vm8, %v714_v15, 0.0 }
 0x2f4   :  { %v721_v32 = vadd.f32 %v720_v3, %v719_v14 }
 0x2f6   :  { %722 = vadd.xlane.f32.xlu1 %v721_v32 }
 0x380   :  { %v698_v10 = vpop.xlane.xlu0 %697 }
 0x381   :  { %v699_v44 = vrot.slane %v698_v10, 4 }
 0x383   :  { %v700_v24 = vadd.f32 %v699_v44, %v698_v10  ;;  %v723_v39 = vpop.xlane.xlu1 %722 }
 0x384   :  { %v724_v16 = vrot.slane %v723_v39, 4 }
 0x385   :  { %v701_v21 = vrot.slane %v700_v24, 2 }
 0x386   :  { %v725_v23 = vadd.f32 %v724_v16, %v723_v39 }
 0x387   :  { %v702_v25 = vadd.f32 %v701_v21, %v700_v24 }
 0x388   :  { %v726_v8 = vrot.slane %v725_v23, 2 }
 0x389   :  { %v703_v26 = vrot.slane %v702_v25, 1 }
 0x38a   :  { %v727_v27 = vadd.f32 %v726_v8, %v725_v23 }
 0x38b   :  { %v704_v29 = vadd.f32 %v703_v26, %v702_v25 }
 0x38c   :  { %v728_v30 = vrot.slane %v727_v27, 1 }
 0x38d   :  { %912 = vpush %v704_v29 }
 0x38e   :  { %v729_v31 = vadd.f32 %v728_v30, %v727_v27 }
 0x390   :  { %914 = vpush %v729_v31 }
 0x3be   :  { %s913_s23 = spop %912 }
 0x3bf   :  { %v706_v17 = vstv %s913_s23 }
 0x3c0   :  { %v708_v34 = vsel %vm398_vm5, %v706_v17, 0.0  ;;  %949 = vrcp.f32 %v706_v17 }
 0x3c1   :  { %s915_s24 = spop %914 }
 0x3c2   :  { %v731_v35 = vstv %s915_s24 }
 0x3c3   :  { %v733_v12 = vsel %vm406_vm7, %v731_v35, %v708_v34  ;;  %v735_v40 = vsel %vm412_vm6, %v731_v35, 0.0  ;;  %951 = vrcp.f32 %v731_v35 }
 0x3c4   :  { %953 = vrcp.f32 %v733_v12 }
 0x3c5   :  { %955 = vrcp.f32 %v735_v40 }
 0x3ca   :  { %v950_v41 = vpop.eup %949 }
 0x3cb   :  { %v740_v38 = vmul.f32 %v950_v41, %v1225_v56 }
 0x3cd   :  { %v952_v45 = vpop.eup %951  ;;  %v791_v36 = vrot.slane %v740_v38, %v1208_v46  ;;  %v811_v48 = vrot.slane %v740_v38, %v1211_v11 }
 0x3ce   :  { %v954_v49 = vpop.eup %953  ;;  %v742_v6 = vmul.f32 %v952_v45, %v1231_v4 }
 0x3cf   :  { %v956_v18 = vpop.eup %955  ;;  %v804_v58 = vmul.f32 %v791_v36, %v1175_v60  ;;  %v824_v7 = vmul.f32 %v811_v48, %v1179_v19  ;;  %v741_v47 = vmul.f32 %v954_v49, %v1237_v13 }
 0x3d0   :  { %v743_v1 = vmul.f32 %v956_v18, %v1241_v22  ;;  %v799_v28 = vrot.slane %v742_v6, %v1208_v46  ;;  %v819_v56 = vrot.slane %v742_v6, %v1211_v11 }
 0x3d1   :  { %v795_v50 = vrot.slane %v741_v47, %v1208_v46  ;;  %v815_v51 = vrot.slane %v741_v47, %v1211_v11  ;;  %v828_v5 = vadd.f32 %v824_v7, %v804_v58 }
 0x3d2   :  { %v803_v4 = vrot.slane %v743_v1, %v1208_v46  ;;  %v806_v52 = vmul.f32 %v799_v28, %v1181_v62  ;;  %v823_v60 = vrot.slane %v743_v1, %v1211_v11  ;;  %v826_v19 = vmul.f32 %v819_v56, %v1185_v43 }
 0x3d3   :  { %v805_v13 = vmul.f32 %v795_v50, %v1177_v61  ;;  %v825_v22 = vmul.f32 %v815_v51, %v1187_v20 }
 0x3d4   :  { %v807_v53 = vmul.f32 %v803_v4, %v1183_v63  ;;  %v827_v37 = vmul.f32 %v823_v60, %v1189_v55  ;;  %v830_v54 = vadd.f32 %v826_v19, %v806_v52 }
 0x3d5   :  { %v829_v57 = vadd.f32 %v825_v22, %v805_v13 }
 0x3d6   :  { %v831_v9 = vadd.f32 %v827_v37, %v807_v53 }
 0x3d7   :  { %v898_v46 = vpack.c.bf16 %v829_v57, %v828_v5 }
 0x3d8   :  { %v899_v59 = vpack.c.bf16 %v831_v9, %v830_v54 }
 0x3d9   :  { %861 = vst [vmem:[#allocation2 + $0x10] sm:$0xff] %v898_v46 }
 0x3da   :  { %862 = vst.msk [vmem:[#allocation2 + $0x18] sm:$0xff] %vm1249_vm11, %v899_v59 }
 0x3db   :  { %968 = shalt.err (!%p965_p4)
}
 0x3dc   :  { %s969_s30 = scalar_lea.hbm %s1311_s3, 512 }
 0x3dd   :  { %p970_p5 = scmp.ne.s32.totalorder %s1311_s3, %s969_s30  ;;  %p973_p6 = scmp.lt.u32.totalorder %s969_s30, %s1311_s3 }
 0x3df   :  { %p975_p7 = pnand %p973_p6, %p970_p5 }
 0x3e1   :  { %978 = shalt.err (!%p975_p7)
}
 0x3e2   :  { %s984_s8 = smov 256   ;;  %s985_s9 = smov 16  }
 0x3e3   :  { %874 = dma.vmem_to_hbm [thread:$0]  %s869_s26, 512, %s1311_s3, [#allocation3], %s984_s8, %s984_s8, %s985_s9  }
 0x3e4   :  { %979 = dma.done.wait [#allocation3], 512  }
 0x3e5   :  { %980 = vsyncadd [#allocation3], 4294966784 }
 0x3e6   :  { %878 = vsyncpa [#allocation3], 1 }

</bundles_post_ra>
